<compile_context>
chip_gen: v5e
topology: v5e:2x2
jax: 0.10.0
libtpu: 0.0.40
codegen_flags: <defaults>
</compile_context>

<pallas_src>
import jax
import jax.numpy as jnp
from jax.experimental import pallas as pl
from jax.experimental.pallas import tpu as pltpu

IN_FEATURES = 768
NUM_CLASS = 2
N_PAD = 128          # lane-dense padded output width
NEG_SLOPE = 0.01     # PyTorch nn.LeakyReLU default
TILE_B = 1024        # rows per grid step (~3 MiB f32 x-tile; safe on v5e/v6e/v7x)


def classifier_kernel(x_ref, w_ref, b_ref, o_ref):
    # LeakyReLU in f32 on the VPU (v5e has no bf16 VALU, so select before downcast)
    x = x_ref[...]
    x = jnp.where(x >= 0, x, NEG_SLOPE * x)
    # Dropout: eval/inference mode -> identity
    # Linear: (TILE_B, 768) bf16 @ (768, 128) bf16 -> f32 accumulate on the MXU
    xb = x.astype(jnp.bfloat16)
    acc = jnp.dot(xb, w_ref[...], preferred_element_type=jnp.float32)
    o_ref[...] = acc + b_ref[...]


def classifier_forward(x, w, b, *, tile_b=TILE_B):
    """x: (B, 768) f32; w: (768, num_class) f32; b: (num_class,) or (1, num_class) f32."""
    B = x.shape[0]
    n_class = w.shape[1]

    # Pick a batch tile: multiple of 8, never larger than needed for small B.
    tile_b = max(8, min(tile_b, pl.cdiv(B, 8) * 8))
    b_pad = pl.cdiv(B, tile_b) * tile_b
    if b_pad != B:
        x = jnp.pad(x, ((0, b_pad - B), (0, 0)))

    # Lane-dense padded parameters: W -> (768, 128) bf16, bias -> (1, 128) f32.
    w_p = jnp.zeros((IN_FEATURES, N_PAD), jnp.bfloat16)
    w_p = w_p.at[:, :n_class].set(w.astype(jnp.bfloat16))
    b_p = jnp.zeros((1, N_PAD), jnp.float32)
    b_p = b_p.at[:, :n_class].set(jnp.reshape(b, (1, n_class)).astype(jnp.float32))

    grid = (b_pad // tile_b,)
    out = pl.pallas_call(
        classifier_kernel,
        out_shape=jax.ShapeDtypeStruct((b_pad, N_PAD), jnp.float32),
        grid_spec=pltpu.PrefetchScalarGridSpec(
            num_scalar_prefetch=0,
            grid=grid,
            in_specs=[
                # x: one batch tile per grid step (auto double-buffered)
                pl.BlockSpec((tile_b, IN_FEATURES), lambda i: (i, 0)),
                # W / bias: constant block index -> stay resident in VMEM
                pl.BlockSpec((IN_FEATURES, N_PAD), lambda i: (0, 0)),
                pl.BlockSpec((1, N_PAD), lambda i: (0, 0)),
            ],
            out_specs=pl.BlockSpec((tile_b, N_PAD), lambda i: (i, 0)),
        ),
        compiler_params=pltpu.CompilerParams(
            dimension_semantics=("parallel",),
        ),
        cost_estimate=pl.CostEstimate(
            flops=2 * b_pad * IN_FEATURES * N_PAD,
            transcendentals=0,
            bytes_accessed=(b_pad * IN_FEATURES * 4        # x read (f32)
                            + b_pad * N_PAD * 4            # out write (f32)
                            + IN_FEATURES * N_PAD * 2      # W read once (bf16)
                            + N_PAD * 4),                  # bias
        ),
    )(x, w_p, b_p)

    return out[:B, :n_class]


def reference_forward(x, w, b):
    x = jnp.where(x >= 0, x, NEG_SLOPE * x)
    return x @ w + jnp.reshape(b, (1, -1))


if __name__ == "__main__":
    key = jax.random.PRNGKey(0)
    kx, kw, kb = jax.random.split(key, 3)

    B = 8  # small batch
    x = jax.random.normal(kx, (B, IN_FEATURES), dtype=jnp.float32)

    # Deterministic parameter init (PyTorch-style uniform bound 1/sqrt(fan_in))
    bound = 1.0 / (IN_FEATURES ** 0.5)
    w = jax.random.uniform(
        kw, (IN_FEATURES, NUM_CLASS), dtype=jnp.float32, minval=-bound, maxval=bound
    )
    b = jax.random.uniform(
        kb, (1, NUM_CLASS), dtype=jnp.float32, minval=-bound, maxval=bound
    )

    out = classifier_forward(x, w, b)
    out = jax.block_until_ready(out)

    ref = reference_forward(x, w, b)
    assert out.shape == (B, NUM_CLASS)
    # bf16 MXU operands with f32 accumulation -> loosen tolerance vs f32 reference.
    assert jnp.allclose(out, ref, atol=2e-2, rtol=2e-2), "mismatch vs reference"

    print("KERNEL_OK")
</pallas_src>

<mosaic_0001>
module attributes {stable_mosaic.version = 11 : i64} {
  func.func @classifier_kernel(%arg0: i32, %arg1: memref<8x768xf32, #tpu.memory_space<vmem>>, %arg2: memref<768x128xbf16, #tpu.memory_space<vmem>>, %arg3: memref<1x128xf32, #tpu.memory_space<vmem>>, %arg4: memref<8x128xf32, #tpu.memory_space<vmem>>) attributes {dimension_semantics = [#tpu.dimension_semantics<parallel>], iteration_bounds = array<i64: 1>, scalar_prefetch = 0 : i64, scratch_operands = 0 : i64, tpu.core_type = #tpu.core_type<tc>, window_params = [{transform_indices = @transform_0, window_bounds = array<i64: 8, 768>}, {pipeline_mode = #tpu.pipeline_mode<synchronous>, transform_indices = @transform_1, window_bounds = array<i64: 768, 128>}, {pipeline_mode = #tpu.pipeline_mode<synchronous>, transform_indices = @transform_2, window_bounds = array<i64: 1, 128>}, {transform_indices = @transform_3, window_bounds = array<i64: 8, 128>}]} {
    %c0 = arith.constant 0 : index
    %c0_0 = arith.constant 0 : index
    %0 = vector.load %arg1[%c0, %c0_0] : memref<8x768xf32, #tpu.memory_space<vmem>>, vector<8x768xf32>
    %cst = arith.constant 0.000000e+00 : f32
    %1 = vector.broadcast %cst : f32 to vector<8x768xf32>
    %2 = arith.cmpf oge, %0, %1 : vector<8x768xf32>
    %cst_1 = arith.constant 0.00999999977 : f32
    %3 = vector.broadcast %cst_1 : f32 to vector<8x768xf32>
    %4 = arith.mulf %3, %0 : vector<8x768xf32>
    %5 = arith.select %2, %0, %4 : vector<8x768xi1>, vector<8x768xf32>
    %6 = arith.truncf %5 : vector<8x768xf32> to vector<8x768xbf16>
    %c0_2 = arith.constant 0 : index
    %c0_3 = arith.constant 0 : index
    %7 = vector.load %arg2[%c0_2, %c0_3] : memref<768x128xbf16, #tpu.memory_space<vmem>>, vector<768x128xbf16>
    %cst_4 = arith.constant dense<0.000000e+00> : vector<8x128xf32>
    %8 = tpu.matmul %6, %7, %cst_4 {dimension_numbers = #tpu.dot_dimension_numbers<[1], [0], [0], [1], [0, 0, 1, 1], [], []>} : vector<8x768xbf16>, vector<768x128xbf16>, vector<8x128xf32> -> vector<8x128xf32>
    %c0_5 = arith.constant 0 : index
    %c0_6 = arith.constant 0 : index
    %9 = vector.load %arg3[%c0_5, %c0_6] : memref<1x128xf32, #tpu.memory_space<vmem>>, vector<1x128xf32>
    %10 = vector.broadcast %9 : vector<1x128xf32> to vector<8x128xf32>
    %11 = arith.addf %8, %10 : vector<8x128xf32>
    %c0_7 = arith.constant 0 : index
    %c0_8 = arith.constant 0 : index
    %12 = vector.load %arg4[%c0_7, %c0_8] : memref<8x128xf32, #tpu.memory_space<vmem>>, vector<8x128xf32>
    tpu.vector_store %arg4[%c0_7, %c0_8], %11 {strides = array<i32>} : memref<8x128xf32, #tpu.memory_space<vmem>>, vector<8x128xf32>,
    return
  }
  func.func @transform_0(%arg0: i32) -> (i32, i32) {
    %c0_i32 = arith.constant 0 : i32
    %c0_i32_0 = arith.constant 0 : i32
    return %arg0, %c0_i32 : i32, i32
  }
  func.func @transform_1(%arg0: i32) -> (i32, i32) {
    %c0_i32 = arith.constant 0 : i32
    %c0_i32_0 = arith.constant 0 : i32
    %c0_i32_1 = arith.constant 0 : i32
    return %c0_i32, %c0_i32_0 : i32, i32
  }
  func.func @transform_2(%arg0: i32) -> (i32, i32) {
    %c0_i32 = arith.constant 0 : i32
    %c0_i32_0 = arith.constant 0 : i32
    %c0_i32_1 = arith.constant 0 : i32
    return %c0_i32, %c0_i32_0 : i32, i32
  }
  func.func @transform_3(%arg0: i32) -> (i32, i32) {
    %c0_i32 = arith.constant 0 : i32
    %c0_i32_0 = arith.constant 0 : i32
    return %arg0, %c0_i32 : i32, i32
  }
}

</mosaic_0001>

<bundles_post_ra>
// kernel: tpu_custom_call.1
= control target key start
LH: loop header
LB: loop body
LE: loop exit
PB: predicated region body
PF: predicated region fallthrough
CT: control target
= control target key end

     0   :  { %8 = vsyncpa [#allocation3], 0  ;;  %s921_s0 = inlined_call_operand.hbm [shape: f32[8,768], index: 0, kind: input, shape index: {}]   ;;  %s922_s1 = inlined_call_operand.hbm [shape: bf16[768,128], index: 1, kind: input, shape index: {}]   ;;  %s923_s2 = inlined_call_operand.vmem [shape: f32[1,128], index: 2, kind: input, shape index: {}]   ;;  %s924_s3 = inlined_call_operand.hbm [shape: f32[8,128], index: 3, kind: output, shape index: {}]  }
   0x1   :  { %9 = vsyncpa [#allocation6], 0 }
   0x2   :  { %10 = vsyncpa [#allocation4], 0  ;;  %s16_s14 = sshll.u32 %s921_s0, 4  ;;  %s884_s15 = smov [#allocation2]   ;;  %s17_s14 = int_to_ptr.hbm [resolvable:$true] %s16_s14 }
   0x3   :  { %s18_s16 = sshll.u32 %s884_s15, 4  ;;  %s26_s19 = sshll.u32 %s922_s1, 4  ;;  %s19_s16 = int_to_ptr.vmem [resolvable:$true] %s18_s16  ;;  %s27_s19 = int_to_ptr.hbm [resolvable:$true] %s26_s19 }
   0x4   :  { %21 = dma.hbm_to_vmem [thread:$0]  %s17_s14, 768, %s19_s16, [#allocation3]  }
   0x5   :  { %s885_s20 = smov [#allocation5]   ;;  %s886_s22 = smov 64  }
   0x6   :  { %s28_s21 = sshll.u32 %s885_s20, 4  ;;  %s887_s23 = smov 4   ;;  %s29_s21 = int_to_ptr.vmem [resolvable:$true] %s28_s21 }
   0x7   :  { %34 = dma.hbm_to_vmem [thread:$0]  %s27_s19, 6144, %s29_s21, [#allocation6], %s886_s22, %s886_s22, %s887_s23  }
   0x8   :  { %878 = dma.done.wait [#allocation3], 768  }
   0x9   :  { %879 = vsyncadd [#allocation3], 4294966528 }
   0xa   :  { %880 = dma.done.wait [#allocation6], 6144  }
   0xb   :  { %881 = vsyncadd [#allocation6], 4294961152  ;;  %v759_v0 = vld [vmem:[#allocation5 + $0x38] sm:$0xff]  ;;  %v758_v2 = vld [vmem:[#allocation5 + $0x30] sm:$0xff]  ;;  %s888_s24 = smov [#allocation7]   ;;  %s549_s28 = sshll.u32 %s924_s3, 4  ;;  %s550_s28 = int_to_ptr.hbm [resolvable:$true] %s549_s28 }
   0xc   :  { %v767_v1 = vld [vmem:[#allocation5 + $0x78] sm:$0xff]  ;;  %463 = vmatpush.bf16.msra.mxu0 %v759_v0  ;;  %v766_v3 = vld [vmem:[#allocation5 + $0x70] sm:$0xff]  ;;  %v757_v8 = vld [vmem:[#allocation5 + $0x28] sm:$0xff]  ;;  %s547_s25 = sshll.u32 %s888_s24, 4  ;;  %s548_s25 = int_to_ptr.vmem [resolvable:$true] %s547_s25 }
   0xd   :  { %476 = vmatpush.bf16.msra.mxu1 %v767_v1  ;;  %v775_v4 = vld [vmem:[#allocation5 + $0xb8] sm:$0xff]  ;;  %v774_v6 = vld [vmem:[#allocation5 + $0xb0] sm:$0xff]  ;;  %v765_v9 = vld [vmem:[#allocation5 + $0x68] sm:$0xff] }
   0xe   :  { %v783_v5 = vld [vmem:[#allocation5 + $0xf8] sm:$0xff]  ;;  %489 = vmatpush.bf16.msra.mxu2 %v775_v4  ;;  %v782_v7 = vld [vmem:[#allocation5 + $0xf0] sm:$0xff]  ;;  %v773_v10 = vld [vmem:[#allocation5 + $0xa8] sm:$0xff] }
   0xf   :  { %502 = vmatpush.bf16.msra.mxu3 %v783_v5  ;;  %v781_v11 = vld [vmem:[#allocation5 + $0xe8] sm:$0xff]  ;;  %v756_v12 = vld [vmem:[#allocation5 + $0x20] sm:$0xff]  ;;  %v755_v16 = vld [vmem:[#allocation5 + $0x18] sm:$0xff] }
  0x10   :  { %464 = vmatpush.bf16.msra.mxu0 %v758_v2  ;;  %v764_v13 = vld [vmem:[#allocation5 + $0x60] sm:$0xff]  ;;  %v763_v17 = vld [vmem:[#allocation5 + $0x58] sm:$0xff]  ;;  %v754_v20 = vld [vmem:[#allocation5 + $0x10] sm:$0xff] }
  0x11   :  { %477 = vmatpush.bf16.msra.mxu1 %v766_v3  ;;  %v772_v14 = vld [vmem:[#allocation5 + $0xa0] sm:$0xff]  ;;  %v771_v18 = vld [vmem:[#allocation5 + $0x98] sm:$0xff]  ;;  %v762_v21 = vld [vmem:[#allocation5 + $0x50] sm:$0xff] }
  0x12   :  { %490 = vmatpush.bf16.msra.mxu2 %v774_v6  ;;  %v780_v15 = vld [vmem:[#allocation5 + $0xe0] sm:$0xff]  ;;  %v779_v19 = vld [vmem:[#allocation5 + $0xd8] sm:$0xff]  ;;  %v45_v22 = vld [vmem:[#allocation2] sm:$0xff] }
  0x13   :  { %503 = vmatpush.bf16.msra.mxu3 %v782_v7  ;;  %v46_v23 = vld [vmem:[#allocation2 + $0x8] sm:$0xff]  ;;  %v770_v24 = vld [vmem:[#allocation5 + $0x90] sm:$0xff]  ;;  %v753_v26 = vld [vmem:[#allocation5 + $0x8] sm:$0xff]  ;;  %v57_v28 = vmul.f32 0.01, %v45_v22  ;;  %vm51_vm0 = vcmp.ge.f32.partialorder %v45_v22, 0.0 }
  0x14   :  { %465 = vmatpush.bf16.msra.mxu0 %v757_v8  ;;  %v778_v25 = vld [vmem:[#allocation5 + $0xd0] sm:$0xff]  ;;  %v761_v27 = vld [vmem:[#allocation5 + $0x48] sm:$0xff]  ;;  %v58_v29 = vmul.f32 0.01, %v46_v23  ;;  %v47_v30 = vld [vmem:[#allocation2 + $0x10] sm:$0xff]  ;;  %vm52_vm1 = vcmp.ge.f32.partialorder %v46_v23, 0.0 }
  0x15   :  { %478 = vmatpush.bf16.msra.mxu1 %v765_v9  ;;  %v48_v31 = vld [vmem:[#allocation2 + $0x18] sm:$0xff]  ;;  %v59_v34 = vmul.f32 0.01, %v47_v30  ;;  %v752_v36 = vld [vmem:[#allocation5] sm:$0xff]  ;;  %v63_v38 = vsel %vm51_vm0, %v45_v22, %v57_v28  ;;  %vm53_vm2 = vcmp.ge.f32.partialorder %v47_v30, 0.0  ;;  %v791_v40 = vld [vmem:[#allocation5 + $0x138] sm:$0xff] }
  0x16   :  { %491 = vmatpush.bf16.msra.mxu2 %v773_v10  ;;  %v769_v32 = vld [vmem:[#allocation5 + $0x88] sm:$0xff]  ;;  %v60_v35 = vmul.f32 0.01, %v48_v31  ;;  %v760_v37 = vld [vmem:[#allocation5 + $0x40] sm:$0xff]  ;;  %v64_v39 = vsel %vm52_vm1, %v46_v23, %v58_v29  ;;  %vm54_vm3 = vcmp.ge.f32.partialorder %v48_v31, 0.0  ;;  %v799_v41 = vld [vmem:[#allocation5 + $0x178] sm:$0xff]  ;;  %v69_v44 = vpack.c.bf16 %v63_v38, %v63_v38 }
  0x17   :  { %504 = vmatpush.bf16.msra.mxu3 %v781_v11  ;;  %v777_v33 = vld [vmem:[#allocation5 + $0xc8] sm:$0xff]  ;;  %v768_v42 = vld [vmem:[#allocation5 + $0x80] sm:$0xff]  ;;  %v70_v45 = vpack.c.bf16 %v64_v39, %v64_v39  ;;  %v65_v46 = vsel %vm53_vm2, %v47_v30, %v59_v34  ;;  %v790_v48 = vld [vmem:[#allocation5 + $0x130] sm:$0xff] }
  0x18   :  { %466 = vmatpush.bf16.msra.mxu0 %v756_v12  ;;  %v776_v43 = vld [vmem:[#allocation5 + $0xc0] sm:$0xff]  ;;  %v66_v47 = vsel %vm54_vm3, %v48_v31, %v60_v35  ;;  %v798_v49 = vld [vmem:[#allocation5 + $0x170] sm:$0xff]  ;;  %v71_v50 = vpack.c.bf16 %v65_v46, %v65_v46  ;;  %v789_v52 = vld [vmem:[#allocation5 + $0x128] sm:$0xff] }
  0x19   :  { %479 = vmatpush.bf16.msra.mxu1 %v764_v13  ;;  %v72_v51 = vpack.c.bf16 %v66_v47, %v66_v47  ;;  %v797_v53 = vld [vmem:[#allocation5 + $0x168] sm:$0xff]  ;;  %v788_v54 = vld [vmem:[#allocation5 + $0x120] sm:$0xff]  ;;  %v787_v56 = vld [vmem:[#allocation5 + $0x118] sm:$0xff] }
  0x1a   :  { %492 = vmatpush.bf16.msra.mxu2 %v772_v14  ;;  %v796_v55 = vld [vmem:[#allocation5 + $0x160] sm:$0xff]  ;;  %v795_v57 = vld [vmem:[#allocation5 + $0x158] sm:$0xff]  ;;  %v786_v58 = vld [vmem:[#allocation5 + $0x110] sm:$0xff] }
  0x1b   :  { %505 = vmatpush.bf16.msra.mxu3 %v780_v15  ;;  %v794_v59 = vld [vmem:[#allocation5 + $0x150] sm:$0xff]  ;;  %v50_v61 = vld [vmem:[#allocation2 + $0x28] sm:$0xff]  ;;  %v785_v62 = vld [vmem:[#allocation5 + $0x108] sm:$0xff] }
  0x1c   :  { %467 = vmatpush.bf16.msra.mxu0 %v755_v16  ;;  %v49_v60 = vld [vmem:[#allocation2 + $0x20] sm:$0xff]  ;;  %v793_v63 = vld [vmem:[#allocation5 + $0x148] sm:$0xff]  ;;  %v62_v1 = vmul.f32 0.01, %v50_v61  ;;  %vm56_vm5 = vcmp.ge.f32.partialorder %v50_v61, 0.0  ;;  %v784_v2 = vld [vmem:[#allocation5 + $0x100] sm:$0xff] }
  0x1d   :  { %480 = vmatpush.bf16.msra.mxu1 %v763_v17  ;;  %v61_v0 = vmul.f32 0.01, %v49_v60  ;;  %vm55_vm4 = vcmp.ge.f32.partialorder %v49_v60, 0.0  ;;  %v792_v3 = vld [vmem:[#allocation5 + $0x140] sm:$0xff]  ;;  %v805_v14 = vld [vmem:[%s923_s2] ss:$0 sm:$0xff] }
  0x1e   :  { %493 = vmatpush.bf16.msra.mxu2 %v771_v18  ;;  %v68_v5 = vsel %vm56_vm5, %v50_v61, %v62_v1 }
  0x1f   :  { %506 = vmatpush.bf16.msra.mxu3 %v779_v19  ;;  %v67_v4 = vsel %vm55_vm4, %v49_v60, %v61_v0  ;;  %v74_v7 = vpack.c.bf16 %v68_v5, %v68_v5 }
  0x20   :  { %468 = vmatpush.bf16.msra.mxu0 %v754_v20  ;;  %v73_v6 = vpack.c.bf16 %v67_v4, %v67_v4 }
  0x21   :  { %481 = vmatpush.bf16.msra.mxu1 %v762_v21 }
  0x22   :  { %494 = vmatpush.bf16.msra.mxu2 %v770_v24 }
  0x23   :  { %507 = vmatpush.bf16.msra.mxu3 %v778_v25 }
  0x24   :  { %469 = vmatpush.bf16.msra.mxu0 %v753_v26 }
  0x25   :  { %482 = vmatpush.bf16.msra.mxu1 %v761_v27 }
  0x26   :  { %495 = vmatpush.bf16.msra.mxu2 %v769_v32 }
  0x27   :  { %508 = vmatpush.bf16.msra.mxu3 %v777_v33 }
  0x28   :  { %470 = vmatpush.bf16.msra.mxu0 %v752_v36 }
  0x29   :  { %483 = vmatpush.bf16.msra.mxu1 %v760_v37 }
  0x2a   :  { %496 = vmatpush.bf16.msra.mxu2 %v768_v42 }
  0x2b   :  { %509 = vmatpush.bf16.msra.mxu3 %v776_v43  ;;  %471 = vmatmul.bf16.vlgmr.msra.gmra.mxu0 %v69_v44 }
  0x2c   :  { %515 = vmatpush.bf16.msrb.mxu0 %v791_v40  ;;  %484 = vmatmul.bf16.vlgmr.msra.gmra.mxu1 %v70_v45 }
  0x2d   :  { %528 = vmatpush.bf16.msrb.mxu1 %v799_v41  ;;  %497 = vmatmul.bf16.vlgmr.msra.gmra.mxu2 %v71_v50 }
  0x2e   :  { %510 = vmatmul.bf16.vlgmr.msra.gmra.mxu3 %v72_v51 }
  0x30   :  { %516 = vmatpush.bf16.msrb.mxu0 %v790_v48 }
  0x31   :  { %529 = vmatpush.bf16.msrb.mxu1 %v798_v49 }
  0x34   :  { %517 = vmatpush.bf16.msrb.mxu0 %v789_v52 }
  0x35   :  { %530 = vmatpush.bf16.msrb.mxu1 %v797_v53 }
  0x38   :  { %518 = vmatpush.bf16.msrb.mxu0 %v788_v54 }
  0x39   :  { %531 = vmatpush.bf16.msrb.mxu1 %v796_v55 }
  0x3c   :  { %519 = vmatpush.bf16.msrb.mxu0 %v787_v56 }
  0x3d   :  { %532 = vmatpush.bf16.msrb.mxu1 %v795_v57 }
  0x40   :  { %520 = vmatpush.bf16.msrb.mxu0 %v786_v58 }
  0x41   :  { %533 = vmatpush.bf16.msrb.mxu1 %v794_v59 }
  0x44   :  { %521 = vmatpush.bf16.msrb.mxu0 %v785_v62 }
  0x45   :  { %534 = vmatpush.bf16.msrb.mxu1 %v793_v63 }
  0x48   :  { %522 = vmatpush.bf16.msrb.mxu0 %v784_v2 }
  0x49   :  { %535 = vmatpush.bf16.msrb.mxu1 %v792_v3 }
  0x4b   :  { %523 = vmatmul.bf16.vlgmr.msrb.gmra.mxu0 %v73_v6 }
  0x4c   :  { %536 = vmatmul.bf16.vlgmr.msrb.gmra.mxu1 %v74_v7 }
  0xa8   :  { %v472_v8 = vpop.f32.mrf.mxu0 }
  0xa9   :  { %v485_v9 = vpop.f32.mrf.mxu1  ;;  %v473_v15 = vadd.f32 %v805_v14, %v472_v8 }
  0xab   :  { %v486_v18 = vadd.f32 %v485_v9, %v473_v15 }
  0xb0   :  { %v474_v10 = vpop.f32.mrf.mxu0  ;;  %v498_v12 = vpop.f32.mrf.mxu2 }
  0xb1   :  { %v487_v11 = vpop.f32.mrf.mxu1  ;;  %v511_v13 = vpop.f32.mrf.mxu3  ;;  %v499_v19 = vadd.f32 %v498_v12, %v486_v18 }
  0xb3   :  { %v512_v20 = vadd.f32 %v511_v13, %v499_v19 }
  0xb8   :  { %v500_v16 = vpop.f32.mrf.mxu2 }
  0xb9   :  { %v513_v17 = vpop.f32.mrf.mxu3 }
  0xc8   :  { %v524_v21 = vpop.f32.mrf.mxu0 }
  0xc9   :  { %v537_v22 = vpop.f32.mrf.mxu1  ;;  %v525_v23 = vadd.f32 %v524_v21, %v512_v20 }
  0xcb   :  { %v538_v24 = vadd.f32 %v537_v22, %v525_v23 }
  0xcd   :  { %541 = vst [vmem:[#allocation7] sm:$0xff] %v538_v24 }
  0xce   :  { %552 = dma.vmem_to_hbm [thread:$0]  %s548_s25, 128, %s550_s28, [#allocation4]  }
  0xd0   :  { %v526_v25 = vpop.f32.mrf.mxu0 }
  0xd1   :  { %v539_v26 = vpop.f32.mrf.mxu1 }
  0xd2   :  { %882 = dma.done.wait [#allocation4], 128  }
  0xd3   :  { %883 = vsyncadd [#allocation4], 4294967168 }
  0xd4   :  { %557 = vsyncpa [#allocation3], 1 }
  0xd5   :  { %558 = vsyncpa [#allocation6], 1 }
  0xd6   :  { %559 = vsyncpa [#allocation4], 1 }

</bundles_post_ra>
